<compile_context>
chip_gen: v7x
topology: tpu7x:2x2x1
jax: 0.10.0
libtpu: 0.0.40
codegen_flags: <defaults>
</compile_context>

<pallas_src>
import jax
import jax.numpy as jnp
from jax.experimental import pallas as pl
from jax.experimental.pallas import tpu as pltpu


def _round_up(x, m):
    return ((x + m - 1) // m) * m


def _make_segmenter_kernel(offsets, c_mid, l_lane):
    """offsets: static flat offsets (dh*Wp + dw) of the 9 conv taps."""

    def kernel(x_ref, w1_ref, b1_ref, w2_ref, b2_ref, o_ref):
        # x_ref : (C_in, Lin)      zero-padded, row-major flattened padded image
        # w1_ref: (9, C_mid, C_in) encoder 3x3 weights, one (C_mid, C_in) slab per tap
        # b1_ref: (C_mid, 1)       encoder bias
        # w2_ref: (C_cls, C_mid)   decoder 1x1 weights (transposed)
        # b2_ref: (C_cls, 1)       decoder bias
        # o_ref : (C_cls, L_lane)  lane-dense output block (L_lane % 128 == 0)
        acc = jnp.zeros((c_mid, l_lane), dtype=jnp.float32)
        for k, off in enumerate(offsets):
            # Static lane-shifted window = in-kernel "im2col" for tap k.
            xs = x_ref[:, off:off + l_lane]                       # (C_in, L_lane)
            acc = acc + jnp.dot(w1_ref[k], xs,
                                preferred_element_type=jnp.float32)
        h = jnp.maximum(acc + b1_ref[...], 0.0)                   # encoder bias + ReLU
        y = jnp.dot(w2_ref[...], h,
                    preferred_element_type=jnp.float32) + b2_ref[...]
        o_ref[...] = y.astype(o_ref.dtype)

    return kernel


def segmenter_forward(x_nchw, w1, b1, w2, b2):
    """x_nchw: (N, C_in, H, W) f32.  w1: (3,3,C_in,C_mid) HWIO.  w2: (C_mid,C_cls).

    Returns (N, C_cls, H, W) = decoder(encoder(x))."""
    N, C_in, H, W = x_nchw.shape
    C_mid = w1.shape[-1]
    C_cls = w2.shape[-1]

    Hp, Wp = H + 2, W + 2
    L = Hp * Wp                                   # flattened padded pixel count
    L_lane = _round_up(L, 128)                    # lane-dense output width
    Lin = _round_up(L_lane + 2 * Wp + 2, 128)     # input width incl. shift halo

    # Zero "same" border, flatten spatial dims row-major, then shift right by
    # Wp+1 zeros so tap (dh, dw) is the contiguous slice [off, off+L_lane) with
    # off = dh*Wp + dw.  Pads/reshapes only -- no transpose, no 9x inflation.
    x_pad = jnp.pad(x_nchw, ((0, 0), (0, 0), (1, 1), (1, 1)))
    x_flat = x_pad.reshape(N, C_in, L)
    x_in = jnp.pad(x_flat, ((0, 0), (0, 0), (Wp + 1, Lin - L - (Wp + 1))))

    # Weight layouts: one (C_mid, C_in) slab per tap, taps ordered (dh, dw).
    w1_k = jnp.transpose(w1.reshape(9, C_in, C_mid), (0, 2, 1))   # (9, C_mid, C_in)
    b1_col = b1.reshape(C_mid, 1)
    w2_mat = w2.T                                                 # (C_cls, C_mid)
    b2_col = b2.reshape(C_cls, 1)

    offsets = tuple(dh * Wp + dw for dh in range(3) for dw in range(3))
    kernel = _make_segmenter_kernel(offsets, C_mid, L_lane)

    flops = N * 2 * L_lane * (9 * C_in * C_mid + C_mid * C_cls)
    bytes_accessed = 4 * (x_in.size + w1_k.size + b1_col.size + w2_mat.size
                          + b2_col.size + N * C_cls * L_lane)

    out_flat = pl.pallas_call(
        kernel,
        out_shape=jax.ShapeDtypeStruct((N, C_cls, L_lane), jnp.float32),
        grid_spec=pltpu.PrefetchScalarGridSpec(
            num_scalar_prefetch=0,
            grid=(N,),
            in_specs=[
                pl.BlockSpec((None, C_in, Lin), lambda n: (n, 0, 0)),
                pl.BlockSpec((9, C_mid, C_in), lambda n: (0, 0, 0)),
                pl.BlockSpec((C_mid, 1), lambda n: (0, 0)),
                pl.BlockSpec((C_cls, C_mid), lambda n: (0, 0)),
                pl.BlockSpec((C_cls, 1), lambda n: (0, 0)),
            ],
            out_specs=pl.BlockSpec((None, C_cls, L_lane), lambda n: (n, 0, 0)),
        ),
        compiler_params=pltpu.CompilerParams(
            dimension_semantics=("parallel",)),
        cost_estimate=pl.CostEstimate(
            flops=flops, transcendentals=0, bytes_accessed=bytes_accessed),
    )(x_in, w1_k, b1_col, w2_mat, b2_col)

    # (N, C_cls, L_lane) -> (N, C_cls, H, W): slices + reshape only (no transpose).
    out = out_flat[:, :, :L].reshape(N, C_cls, Hp, Wp)[:, :, 1:H + 1, 1:W + 1]
    return out


segmenter_forward = jax.jit(segmenter_forward)


def _reference_forward(x_nchw, w1, b1, w2, b2):
    """Pure-JAX reference (conv_general_dilated) for correctness checking."""
    enc = jax.lax.conv_general_dilated(
        x_nchw, w1, window_strides=(1, 1), padding="SAME",
        dimension_numbers=("NCHW", "HWIO", "NCHW"))
    enc = jnp.maximum(enc + b1[None, :, None, None], 0.0)
    dec = jax.lax.conv_general_dilated(
        enc, w2[None, None, :, :], window_strides=(1, 1), padding="VALID",
        dimension_numbers=("NCHW", "HWIO", "NCHW"))
    return dec + b2[None, :, None, None]


if __name__ == "__main__":
    key = jax.random.PRNGKey(0)
    k_x, k_w1, k_b1, k_w2, k_b2 = jax.random.split(key, 5)

    N, C_in, H, W = 2, 4, 16, 16
    C_mid, C_cls = 8, 3

    x = jax.random.normal(k_x, (N, C_in, H, W), dtype=jnp.float32)

    # Deterministic parameter init (small fan-in scaled normals).
    w1 = jax.random.normal(k_w1, (3, 3, C_in, C_mid), dtype=jnp.float32) * 0.1
    b1 = jax.random.normal(k_b1, (C_mid,), dtype=jnp.float32) * 0.1
    w2 = jax.random.normal(k_w2, (C_mid, C_cls), dtype=jnp.float32) * 0.1
    b2 = jax.random.normal(k_b2, (C_cls,), dtype=jnp.float32) * 0.1

    out = segmenter_forward(x, w1, b1, w2, b2)
    out = jax.block_until_ready(out)

    ref = jax.block_until_ready(_reference_forward(x, w1, b1, w2, b2))
    assert out.shape == (N, C_cls, H, W), out.shape
    assert jnp.allclose(out, ref, atol=1e-4, rtol=1e-4), "mismatch vs reference"

    print("KERNEL_OK")
</pallas_src>

<mosaic_0001>
module attributes {stable_mosaic.version = 11 : i64} {
  func.func @kernel(%arg0: i32, %arg1: memref<1x4x512xf32, #tpu.memory_space<vmem>>, %arg2: memref<9x8x4xf32, #tpu.memory_space<vmem>>, %arg3: memref<8x1xf32, #tpu.memory_space<vmem>>, %arg4: memref<3x8xf32, #tpu.memory_space<vmem>>, %arg5: memref<3x1xf32, #tpu.memory_space<vmem>>, %arg6: memref<1x3x384xf32, #tpu.memory_space<vmem>>) attributes {dimension_semantics = [#tpu.dimension_semantics<parallel>], iteration_bounds = array<i64: 2>, scalar_prefetch = 0 : i64, scratch_operands = 0 : i64, tpu.core_type = #tpu.core_type<tc>, window_params = [{transform_indices = @transform_0, window_bounds = array<i64: 1, 4, 512>}, {pipeline_mode = #tpu.pipeline_mode<synchronous>, transform_indices = @transform_1, window_bounds = array<i64: 9, 8, 4>}, {pipeline_mode = #tpu.pipeline_mode<synchronous>, transform_indices = @transform_2, window_bounds = array<i64: 8, 1>}, {pipeline_mode = #tpu.pipeline_mode<synchronous>, transform_indices = @transform_3, window_bounds = array<i64: 3, 8>}, {pipeline_mode = #tpu.pipeline_mode<synchronous>, transform_indices = @transform_4, window_bounds = array<i64: 3, 1>}, {transform_indices = @transform_5, window_bounds = array<i64: 1, 3, 384>}]} {
    %cst = arith.constant 0.000000e+00 : f32
    %0 = vector.broadcast %cst : f32 to vector<8x384xf32>
    %c0 = arith.constant 0 : index
    %c0_0 = arith.constant 0 : index
    %c0_1 = arith.constant 0 : index
    %1 = vector.load %arg1[%c0, %c0_0, %c0_1] : memref<1x4x512xf32, #tpu.memory_space<vmem>>, vector<1x4x384xf32>
    %2 = vector.shape_cast %1 : vector<1x4x384xf32> to vector<4x384xf32>
    %c0_2 = arith.constant 0 : index
    %c0_3 = arith.constant 0 : index
    %c0_4 = arith.constant 0 : index
    %3 = vector.load %arg2[%c0_2, %c0_3, %c0_4] : memref<9x8x4xf32, #tpu.memory_space<vmem>>, vector<1x8x4xf32>
    %4 = vector.shape_cast %3 : vector<1x8x4xf32> to vector<8x4xf32>
    %cst_5 = arith.constant dense<0.000000e+00> : vector<8x384xf32>
    %5 = tpu.matmul %4, %2, %cst_5 {dimension_numbers = #tpu.dot_dimension_numbers<[1], [0], [0], [1], [0, 0, 1, 1], [], []>} : vector<8x4xf32>, vector<4x384xf32>, vector<8x384xf32> -> vector<8x384xf32>
    %6 = arith.addf %0, %5 : vector<8x384xf32>
    %c0_6 = arith.constant 0 : index
    %c0_7 = arith.constant 0 : index
    %c1 = arith.constant 1 : index
    %7 = vector.load %arg1[%c0_6, %c0_7, %c1] : memref<1x4x512xf32, #tpu.memory_space<vmem>>, vector<1x4x384xf32>
    %8 = vector.shape_cast %7 : vector<1x4x384xf32> to vector<4x384xf32>
    %c1_8 = arith.constant 1 : index
    %c0_9 = arith.constant 0 : index
    %c0_10 = arith.constant 0 : index
    %9 = vector.load %arg2[%c1_8, %c0_9, %c0_10] : memref<9x8x4xf32, #tpu.memory_space<vmem>>, vector<1x8x4xf32>
    %10 = vector.shape_cast %9 : vector<1x8x4xf32> to vector<8x4xf32>
    %cst_11 = arith.constant dense<0.000000e+00> : vector<8x384xf32>
    %11 = tpu.matmul %10, %8, %cst_11 {dimension_numbers = #tpu.dot_dimension_numbers<[1], [0], [0], [1], [0, 0, 1, 1], [], []>} : vector<8x4xf32>, vector<4x384xf32>, vector<8x384xf32> -> vector<8x384xf32>
    %12 = arith.addf %6, %11 : vector<8x384xf32>
    %c0_12 = arith.constant 0 : index
    %c0_13 = arith.constant 0 : index
    %c2 = arith.constant 2 : index
    %13 = vector.load %arg1[%c0_12, %c0_13, %c2] : memref<1x4x512xf32, #tpu.memory_space<vmem>>, vector<1x4x384xf32>
    %14 = vector.shape_cast %13 : vector<1x4x384xf32> to vector<4x384xf32>
    %c2_14 = arith.constant 2 : index
    %c0_15 = arith.constant 0 : index
    %c0_16 = arith.constant 0 : index
    %15 = vector.load %arg2[%c2_14, %c0_15, %c0_16] : memref<9x8x4xf32, #tpu.memory_space<vmem>>, vector<1x8x4xf32>
    %16 = vector.shape_cast %15 : vector<1x8x4xf32> to vector<8x4xf32>
    %cst_17 = arith.constant dense<0.000000e+00> : vector<8x384xf32>
    %17 = tpu.matmul %16, %14, %cst_17 {dimension_numbers = #tpu.dot_dimension_numbers<[1], [0], [0], [1], [0, 0, 1, 1], [], []>} : vector<8x4xf32>, vector<4x384xf32>, vector<8x384xf32> -> vector<8x384xf32>
    %18 = arith.addf %12, %17 : vector<8x384xf32>
    %c0_18 = arith.constant 0 : index
    %c0_19 = arith.constant 0 : index
    %c18 = arith.constant 18 : index
    %19 = vector.load %arg1[%c0_18, %c0_19, %c18] : memref<1x4x512xf32, #tpu.memory_space<vmem>>, vector<1x4x384xf32>
    %20 = vector.shape_cast %19 : vector<1x4x384xf32> to vector<4x384xf32>
    %c3 = arith.constant 3 : index
    %c0_20 = arith.constant 0 : index
    %c0_21 = arith.constant 0 : index
    %21 = vector.load %arg2[%c3, %c0_20, %c0_21] : memref<9x8x4xf32, #tpu.memory_space<vmem>>, vector<1x8x4xf32>
    %22 = vector.shape_cast %21 : vector<1x8x4xf32> to vector<8x4xf32>
    %cst_22 = arith.constant dense<0.000000e+00> : vector<8x384xf32>
    %23 = tpu.matmul %22, %20, %cst_22 {dimension_numbers = #tpu.dot_dimension_numbers<[1], [0], [0], [1], [0, 0, 1, 1], [], []>} : vector<8x4xf32>, vector<4x384xf32>, vector<8x384xf32> -> vector<8x384xf32>
    %24 = arith.addf %18, %23 : vector<8x384xf32>
    %c0_23 = arith.constant 0 : index
    %c0_24 = arith.constant 0 : index
    %c19 = arith.constant 19 : index
    %25 = vector.load %arg1[%c0_23, %c0_24, %c19] : memref<1x4x512xf32, #tpu.memory_space<vmem>>, vector<1x4x384xf32>
    %26 = vector.shape_cast %25 : vector<1x4x384xf32> to vector<4x384xf32>
    %c4 = arith.constant 4 : index
    %c0_25 = arith.constant 0 : index
    %c0_26 = arith.constant 0 : index
    %27 = vector.load %arg2[%c4, %c0_25, %c0_26] : memref<9x8x4xf32, #tpu.memory_space<vmem>>, vector<1x8x4xf32>
    %28 = vector.shape_cast %27 : vector<1x8x4xf32> to vector<8x4xf32>
    %cst_27 = arith.constant dense<0.000000e+00> : vector<8x384xf32>
    %29 = tpu.matmul %28, %26, %cst_27 {dimension_numbers = #tpu.dot_dimension_numbers<[1], [0], [0], [1], [0, 0, 1, 1], [], []>} : vector<8x4xf32>, vector<4x384xf32>, vector<8x384xf32> -> vector<8x384xf32>
    %30 = arith.addf %24, %29 : vector<8x384xf32>
    %c0_28 = arith.constant 0 : index
    %c0_29 = arith.constant 0 : index
    %c20 = arith.constant 20 : index
    %31 = vector.load %arg1[%c0_28, %c0_29, %c20] : memref<1x4x512xf32, #tpu.memory_space<vmem>>, vector<1x4x384xf32>
    %32 = vector.shape_cast %31 : vector<1x4x384xf32> to vector<4x384xf32>
    %c5 = arith.constant 5 : index
    %c0_30 = arith.constant 0 : index
    %c0_31 = arith.constant 0 : index
    %33 = vector.load %arg2[%c5, %c0_30, %c0_31] : memref<9x8x4xf32, #tpu.memory_space<vmem>>, vector<1x8x4xf32>
    %34 = vector.shape_cast %33 : vector<1x8x4xf32> to vector<8x4xf32>
    %cst_32 = arith.constant dense<0.000000e+00> : vector<8x384xf32>
    %35 = tpu.matmul %34, %32, %cst_32 {dimension_numbers = #tpu.dot_dimension_numbers<[1], [0], [0], [1], [0, 0, 1, 1], [], []>} : vector<8x4xf32>, vector<4x384xf32>, vector<8x384xf32> -> vector<8x384xf32>
    %36 = arith.addf %30, %35 : vector<8x384xf32>
    %c0_33 = arith.constant 0 : index
    %c0_34 = arith.constant 0 : index
    %c36 = arith.constant 36 : index
    %37 = vector.load %arg1[%c0_33, %c0_34, %c36] : memref<1x4x512xf32, #tpu.memory_space<vmem>>, vector<1x4x384xf32>
    %38 = vector.shape_cast %37 : vector<1x4x384xf32> to vector<4x384xf32>
    %c6 = arith.constant 6 : index
    %c0_35 = arith.constant 0 : index
    %c0_36 = arith.constant 0 : index
    %39 = vector.load %arg2[%c6, %c0_35, %c0_36] : memref<9x8x4xf32, #tpu.memory_space<vmem>>, vector<1x8x4xf32>
    %40 = vector.shape_cast %39 : vector<1x8x4xf32> to vector<8x4xf32>
    %cst_37 = arith.constant dense<0.000000e+00> : vector<8x384xf32>
    %41 = tpu.matmul %40, %38, %cst_37 {dimension_numbers = #tpu.dot_dimension_numbers<[1], [0], [0], [1], [0, 0, 1, 1], [], []>} : vector<8x4xf32>, vector<4x384xf32>, vector<8x384xf32> -> vector<8x384xf32>
    %42 = arith.addf %36, %41 : vector<8x384xf32>
    %c0_38 = arith.constant 0 : index
    %c0_39 = arith.constant 0 : index
    %c37 = arith.constant 37 : index
    %43 = vector.load %arg1[%c0_38, %c0_39, %c37] : memref<1x4x512xf32, #tpu.memory_space<vmem>>, vector<1x4x384xf32>
    %44 = vector.shape_cast %43 : vector<1x4x384xf32> to vector<4x384xf32>
    %c7 = arith.constant 7 : index
    %c0_40 = arith.constant 0 : index
    %c0_41 = arith.constant 0 : index
    %45 = vector.load %arg2[%c7, %c0_40, %c0_41] : memref<9x8x4xf32, #tpu.memory_space<vmem>>, vector<1x8x4xf32>
    %46 = vector.shape_cast %45 : vector<1x8x4xf32> to vector<8x4xf32>
    %cst_42 = arith.constant dense<0.000000e+00> : vector<8x384xf32>
    %47 = tpu.matmul %46, %44, %cst_42 {dimension_numbers = #tpu.dot_dimension_numbers<[1], [0], [0], [1], [0, 0, 1, 1], [], []>} : vector<8x4xf32>, vector<4x384xf32>, vector<8x384xf32> -> vector<8x384xf32>
    %48 = arith.addf %42, %47 : vector<8x384xf32>
    %c0_43 = arith.constant 0 : index
    %c0_44 = arith.constant 0 : index
    %c38 = arith.constant 38 : index
    %49 = vector.load %arg1[%c0_43, %c0_44, %c38] : memref<1x4x512xf32, #tpu.memory_space<vmem>>, vector<1x4x384xf32>
    %50 = vector.shape_cast %49 : vector<1x4x384xf32> to vector<4x384xf32>
    %c8 = arith.constant 8 : index
    %c0_45 = arith.constant 0 : index
    %c0_46 = arith.constant 0 : index
    %51 = vector.load %arg2[%c8, %c0_45, %c0_46] : memref<9x8x4xf32, #tpu.memory_space<vmem>>, vector<1x8x4xf32>
    %52 = vector.shape_cast %51 : vector<1x8x4xf32> to vector<8x4xf32>
    %cst_47 = arith.constant dense<0.000000e+00> : vector<8x384xf32>
    %53 = tpu.matmul %52, %50, %cst_47 {dimension_numbers = #tpu.dot_dimension_numbers<[1], [0], [0], [1], [0, 0, 1, 1], [], []>} : vector<8x4xf32>, vector<4x384xf32>, vector<8x384xf32> -> vector<8x384xf32>
    %54 = arith.addf %48, %53 : vector<8x384xf32>
    %c0_48 = arith.constant 0 : index
    %c0_49 = arith.constant 0 : index
    %55 = vector.load %arg3[%c0_48, %c0_49] : memref<8x1xf32, #tpu.memory_space<vmem>>, vector<8x1xf32>
    %56 = vector.broadcast %55 : vector<8x1xf32> to vector<8x384xf32>
    %57 = arith.addf %54, %56 : vector<8x384xf32>
    %cst_50 = arith.constant 0.000000e+00 : f32
    %58 = vector.broadcast %cst_50 : f32 to vector<8x384xf32>
    %59 = arith.maximumf %57, %58 : vector<8x384xf32>
    %c0_51 = arith.constant 0 : index
    %c0_52 = arith.constant 0 : index
    %60 = vector.load %arg4[%c0_51, %c0_52] : memref<3x8xf32, #tpu.memory_space<vmem>>, vector<3x8xf32>
    %cst_53 = arith.constant dense<0.000000e+00> : vector<3x384xf32>
    %61 = tpu.matmul %60, %59, %cst_53 {dimension_numbers = #tpu.dot_dimension_numbers<[1], [0], [0], [1], [0, 0, 1, 1], [], []>} : vector<3x8xf32>, vector<8x384xf32>, vector<3x384xf32> -> vector<3x384xf32>
    %c0_54 = arith.constant 0 : index
    %c0_55 = arith.constant 0 : index
    %62 = vector.load %arg5[%c0_54, %c0_55] : memref<3x1xf32, #tpu.memory_space<vmem>>, vector<3x1xf32>
    %63 = vector.broadcast %62 : vector<3x1xf32> to vector<3x384xf32>
    %64 = arith.addf %61, %63 : vector<3x384xf32>
    %c0_56 = arith.constant 0 : index
    %c0_57 = arith.constant 0 : index
    %c0_58 = arith.constant 0 : index
    %65 = vector.load %arg6[%c0_56, %c0_57, %c0_58] : memref<1x3x384xf32, #tpu.memory_space<vmem>>, vector<1x3x384xf32>
    %66 = vector.shape_cast %65 : vector<1x3x384xf32> to vector<3x384xf32>
    %67 = vector.shape_cast %64 : vector<3x384xf32> to vector<1x3x384xf32>
    tpu.vector_store %arg6[%c0_56, %c0_57, %c0_58], %67 {strides = array<i32>} : memref<1x3x384xf32, #tpu.memory_space<vmem>>, vector<1x3x384xf32>,
    return
  }
  func.func @transform_0(%arg0: i32) -> (i32, i32, i32) {
    %c0_i32 = arith.constant 0 : i32
    %c0_i32_0 = arith.constant 0 : i32
    %c0_i32_1 = arith.constant 0 : i32
    return %arg0, %c0_i32, %c0_i32_0 : i32, i32, i32
  }
  func.func @transform_1(%arg0: i32) -> (i32, i32, i32) {
    %c0_i32 = arith.constant 0 : i32
    %c0_i32_0 = arith.constant 0 : i32
    %c0_i32_1 = arith.constant 0 : i32
    %c0_i32_2 = arith.constant 0 : i32
    return %c0_i32, %c0_i32_0, %c0_i32_1 : i32, i32, i32
  }
  func.func @transform_2(%arg0: i32) -> (i32, i32) {
    %c0_i32 = arith.constant 0 : i32
    %c0_i32_0 = arith.constant 0 : i32
    %c0_i32_1 = arith.constant 0 : i32
    return %c0_i32, %c0_i32_0 : i32, i32
  }
  func.func @transform_3(%arg0: i32) -> (i32, i32) {
    %c0_i32 = arith.constant 0 : i32
    %c0_i32_0 = arith.constant 0 : i32
    %c0_i32_1 = arith.constant 0 : i32
    return %c0_i32, %c0_i32_0 : i32, i32
  }
  func.func @transform_4(%arg0: i32) -> (i32, i32) {
    %c0_i32 = arith.constant 0 : i32
    %c0_i32_0 = arith.constant 0 : i32
    %c0_i32_1 = arith.constant 0 : i32
    return %c0_i32, %c0_i32_0 : i32, i32
  }
  func.func @transform_5(%arg0: i32) -> (i32, i32, i32) {
    %c0_i32 = arith.constant 0 : i32
    %c0_i32_0 = arith.constant 0 : i32
    %c0_i32_1 = arith.constant 0 : i32
    return %arg0, %c0_i32, %c0_i32_0 : i32, i32, i32
  }
}

</mosaic_0001>

<bundles_post_ra>
// kernel: segmenter_forward.1
= control target key start
LH: loop header
LB: loop body
LE: loop exit
PB: predicated region body
PF: predicated region fallthrough
CT: control target
= control target key end

     0   :  { %s2214_s18 = smov 0   ;;  %s2409_s0 = inlined_call_operand.vmem [shape: f32[2,4,512], index: 0, kind: input, shape index: {}]   ;;  %s2410_s1 = inlined_call_operand.vmem [shape: f32[9,8,4], index: 1, kind: input, shape index: {}]   ;;  %s2411_s2 = inlined_call_operand.vmem [shape: f32[8,1], index: 2, kind: input, shape index: {}]   ;;  %s2412_s3 = inlined_call_operand.vmem [shape: f32[3,8], index: 3, kind: input, shape index: {}]   ;;  %s2413_s4 = inlined_call_operand.vmem [shape: f32[3,1], index: 4, kind: input, shape index: {}]   ;;  %s2414_s5 = inlined_call_operand.vmem [shape: f32[2,3,384], index: 5, kind: output, shape index: {}]  }
   0x1 LB: > { %s1989_s19 = sadd.s32 4294967295, %s2171_s18   ;;  %p1993_p0 = scmp.ge.s32.totalorder %s2171_s18, 1  ;;  %s2171_s18 = sphi %s2214_s18, %s15_s18  }
   0x2   : > { %p187_p1 = scmp.lt.s32.totalorder %s2171_s18, 3 }
   0x4   : > { %p188_p2 = pnand %p1993_p0, %p187_p1 }
   0x5   : > { %p215_p3 = scmp.lt.s32.totalorder (!%p188_p2), %s1989_s19, 1  ;;  %v2173_v0 = vmov (!%p188_p2), 0.0   ;;  %s2174_s24 = smov (!%p188_p2), 127   ;;  %vm2178_vm0 = vmmov (!%p188_p2), 0   ;;  %v2183_v5 = vmov (!%p188_p2), 0   ;;  %v1764_v6 = vld [vmem:[%s2411_s2] sm:$0xff] (!%p188_p2) }
   0x6   : > { %191 = sbr.rel (%p188_p2) target bundleno = 642 (0x282), region = 40  ;;  %323 = vmatprep.mubr.f32.mxu0 (!%p188_p2), %v2173_v0  ;;  %2075 = vmatprep.subr.mxu1 (!%p188_p2), %v2173_v0  ;;  %s2175_s25 = smov (!%p188_p2), 126   ;;  %vm244_vm1 = vcmask (!%p188_p2), 1039360   ;;  %vm252_vm2 = vcmask (!%p188_p2), 1043456   ;;  %v1997_v12 = vld [vmem:[%s2410_s1 + $0x8] sm:$0xff] (!%p188_p2)  ;;  %vm248_vm3 = vcmask (!%p188_p2), 31744  }
   0x7   : > { %s2176_s26 = smov (!%p188_p2), 110   ;;  %s2177_s27 = smov (!%p188_p2), 109   ;;  %2077 = vmatprep.mubr.msk.f32.mxu1 (!%p188_p2), %vm2178_vm0, %v2173_v0  ;;  %2161 = vset.pattern.permute.xlu0 (!%p188_p2), %v2183_v5  ;;  %vm569_vm4 = vcmask (!%p188_p2), 1031168   ;;  %vm742_vm5 = vcmask (!%p188_p2), 900096   ;;  %v227_v19 = vld [vmem:[%s2410_s1] sm:$0xff] (!%p188_p2)  ;;  %vm915_vm6 = vcmask (!%p188_p2), 891904  }
   0x8   : > { %s2179_s28 = smov (!%p188_p2), 108   ;;  %s2180_s29 = smov (!%p188_p2), 92   ;;  %2162 = vset.pattern.permute.xlu1 (!%p188_p2), %v2183_v5  ;;  %v2008_v26 = vld [vmem:[%s2410_s1 + $0x10] sm:$0xff] (!%p188_p2)  ;;  %vm1088_vm7 = vcmask (!%p188_p2), 883712   ;;  %v2014_v35 = vld [vmem:[%s2410_s1 + $0x18] sm:$0xff] (!%p188_p2)  ;;  %vm1261_vm8 = vcmask (!%p188_p2), 752640  }
   0x9   : > { %s2181_s30 = smov (!%p188_p2), 91   ;;  %s2182_s6 = smov (!%p188_p2), 90   ;;  %v2020_v44 = vld [vmem:[%s2410_s1 + $0x20] sm:$0xff] (!%p188_p2)  ;;  %v2026_v53 = vld [vmem:[%s2410_s1 + $0x28] sm:$0xff] (!%p188_p2)  ;;  %vm1434_vm9 = vcmask (!%p188_p2), 744448   ;;  %v2032_v60 = vld [vmem:[%s2410_s1 + $0x30] sm:$0xff] (!%p188_p2) }
   0xa   : > { %vm1607_vm10 = vcmask (!%p188_p2), 736256   ;;  %vm1783_vm11 = vcmask (!%p188_p2), 64512  }
   0xd   : > { %s2416_s19 = smov (!%p215_p3, %s1989_s19), 1 }
   0xe   : > { %s2054_s20 = sshll.u32 %s2416_s19, 4  ;;  %s2141_s8 = smul.u32 12, %s2416_s19 }
   0xf   : > { %s2230_s23 = scalar_lea.vmem %s2409_s0, %s2054_s20 }
  0x10   : > { %v2233_v1 = vld [vmem:[%s2230_s23] sm:$0xff]  ;;  %v229_v3 = vld [vmem:[%s2230_s23 + $0x8] sm:$0xff]  ;;  %s224_s11 = scalar_lea.vmem %s2414_s5, %s2141_s8 }
  0x11   : > { %236 = vrot.lane.b32.xlu1 %v2233_v1, %s2174_s24  ;;  %v2238_v2 = vcombine.high %v2233_v1, %v2233_v1  ;;  %v235_v4 = vcombine.high %v229_v3, %v229_v3  ;;  %v226_v32 = vld [vmem:[%s2230_s23 + $0x8] sm:$0xf] }
  0x13   : > { %238 = vrot.lane.b32.xlu0 %v2238_v2, %s2174_s24 }
  0x15   : > { %561 = vrot.lane.b32.xlu1 %v2233_v1, %s2175_s25 }
  0x17   : > { %240 = vrot.lane.b32.xlu0 %v229_v3, %s2174_s24 }
  0x19   : > { %563 = vrot.lane.b32.xlu1 %v2238_v2, %s2175_s25 }
  0x1b   : > { %565 = vrot.lane.b32.xlu0 %v229_v3, %s2175_s25 }
  0x1d   : > { %738 = vrot.lane.b32.xlu1 %v229_v3, %s2176_s26 }
  0x1f   : > { %736 = vrot.lane.b32.xlu0 %v2238_v2, %s2176_s26 }
  0x21   : > { %909 = vrot.lane.b32.xlu1 %v2238_v2, %s2177_s27 }
  0x23   : > { %734 = vrot.lane.b32.xlu0 %v2233_v1, %s2176_s26 }
  0x25   : > { %907 = vrot.lane.b32.xlu1 %v2233_v1, %s2177_s27 }
  0x27   : > { %911 = vrot.lane.b32.xlu0 %v229_v3, %s2177_s27 }
  0x29   : > { %1082 = vrot.lane.b32.xlu1 %v2238_v2, %s2179_s28 }
  0x2b   : > { %242 = vrot.lane.b32.xlu0 %v235_v4, %s2174_s24 }
  0x2d   : > { %1080 = vrot.lane.b32.xlu1 %v2233_v1, %s2179_s28 }
  0x2f   : > { %1084 = vrot.lane.b32.xlu0 %v229_v3, %s2179_s28 }
  0x31   : > { %740 = vrot.lane.b32.xlu1 %v235_v4, %s2176_s26 }
  0x33   : > { %567 = vrot.lane.b32.xlu0 %v235_v4, %s2175_s25 }
  0x35   : > { %1257 = vrot.lane.b32.xlu1 %v229_v3, %s2180_s29 }
  0x37   : > { %1255 = vrot.lane.b32.xlu0 %v2238_v2, %s2180_s29 }
  0x39   : > { %913 = vrot.lane.b32.xlu1 %v235_v4, %s2177_s27 }
  0x3b   : > { %1253 = vrot.lane.b32.xlu0 %v2233_v1, %s2180_s29 }
  0x3d   : > { %1428 = vrot.lane.b32.xlu1 %v2238_v2, %s2181_s30 }
  0x3f   : > { %1086 = vrot.lane.b32.xlu0 %v235_v4, %s2179_s28 }
  0x41   : > { %1426 = vrot.lane.b32.xlu1 %v2233_v1, %s2181_s30 }
  0x43   : > { %1430 = vrot.lane.b32.xlu0 %v229_v3, %s2181_s30 }
  0x45   : > { %1432 = vrot.lane.b32.xlu1 %v235_v4, %s2181_s30 }
  0x47   : > { %1259 = vrot.lane.b32.xlu0 %v235_v4, %s2180_s29 }
  0x49   : > { %1603 = vrot.lane.b32.xlu1 %v229_v3, %s2182_s6  ;;  %v2038_v3 = vld [vmem:[%s2410_s1 + $0x38] sm:$0xff] }
  0x4b   : > { %1601 = vrot.lane.b32.xlu0 %v2238_v2, %s2182_s6 }
  0x4d   : > { %1605 = vrot.lane.b32.xlu1 %v235_v4, %s2182_s6 }
  0x4f   : > { %1599 = vrot.lane.b32.xlu0 %v2233_v1, %s2182_s6 }
  0x53   : > { %1767 = vperm.xlu0 %2161, %v1764_v6  }
  0x83   : > { %v237_v7 = vpop.permute.xlu1 %236 }
  0x85   : > { %v239_v8 = vpop.permute.xlu0 %238 }
  0x86   : > { %v245_v14 = vsel %vm244_vm1, %v237_v7, %v239_v8 }
  0x87   : > { %v562_v9 = vpop.permute.xlu1 %561 }
  0x89   : > { %v241_v10 = vpop.permute.xlu0 %240 }
  0x8a   : > { %v246_v11 = vsel %vm244_vm1, %v239_v8, %v241_v10  ;;  %v2044_v8 = vld [vmem:[%s2410_s1 + $0x40] sm:$0xff] }
  0x8b   : > { %v564_v13 = vpop.permute.xlu1 %563  ;;  %1998 = vmatprep.subr.msk.mxu0 %vm252_vm2, %v246_v11 }
  0x8c   : > { %1999 = vmatpush1.msk.msra.mxu0 %vm252_vm2, %v245_v14  ;;  %v570_v20 = vsel %vm569_vm4, %v562_v9, %v564_v13 }
  0x8d   : > { %2000 = vmatmul.mubr.msk.f32.vlgmr.msra.gmra.mrb[0].mxu0 %vm248_vm3, %v1997_v12  ;;  %v566_v15 = vpop.permute.xlu0 %565  ;;  %2003 = vmatprep.subr.msk.mxu0 %vm252_vm2, %v2238_v2 }
  0x8e   : > { %v571_v16 = vsel %vm569_vm4, %v564_v13, %v566_v15  ;;  %2004 = vmatpush1.msk.msra.mxu0 %vm252_vm2, %v2233_v1  ;;  %476 = vmatprep.mubr.f32.mxu0 %v2173_v0 }
  0x8f   : > { %v739_v17 = vpop.permute.xlu1 %738  ;;  %2009 = vmatprep.subr.msk.mxu0 %vm252_vm2, %v571_v16 }
  0x91   : > { %v737_v18 = vpop.permute.xlu0 %736 }
  0x92   : > { %v744_v22 = vsel %vm742_vm5, %v737_v18, %v739_v17 }
  0x93   : > { %v910_v21 = vpop.permute.xlu1 %909 }
  0x95   : > { %v735_v23 = vpop.permute.xlu0 %734  ;;  %2005 = vmatmul.mubr.msk.f32.vlgmr.msra.gmra.mrb[0].mxu0 %vm248_vm3, %v227_v19 }
  0x96   : > { %2010 = vmatpush1.msk.msra.mxu0 %vm252_vm2, %v570_v20  ;;  %646 = vmatprep.mubr.f32.mxu0 %v2173_v0  ;;  %v743_v27 = vsel %vm742_vm5, %v735_v23, %v737_v18 }
  0x97   : > { %v908_v24 = vpop.permute.xlu1 %907  ;;  %2015 = vmatprep.subr.msk.mxu0 %vm252_vm2, %v744_v22 }
  0x98   : > { %v916_v38 = vsel %vm915_vm6, %v908_v24, %v910_v21 }
  0x99   : > { %v912_v25 = vpop.permute.xlu0 %911 }
  0x9a   : > { %v917_v29 = vsel %vm915_vm6, %v910_v21, %v912_v25 }
  0x9b   : > { %v1083_v28 = vpop.permute.xlu1 %1082 }
  0x9d   : > { %v243_v30 = vpop.permute.xlu0 %242  ;;  %2011 = vmatmul.mubr.msk.f32.vlgmr.msra.gmra.mrb[0].mxu0 %vm248_vm3, %v2008_v26 }
  0x9e   : > { %2016 = vmatpush1.msk.msra.mxu0 %vm252_vm2, %v743_v27  ;;  %v247_v31 = vsel %vm244_vm1, %v241_v10, %v243_v30  ;;  %819 = vmatprep.mubr.f32.mxu0 %v2173_v0  ;;  %v1777_v10 = vld [vmem:[%s2413_s4] sm:$0x7] }
  0x9f   : > { %v1081_v33 = vpop.permute.xlu1 %1080  ;;  %2076 = vmatpush3.msk.msra.mxu1 %vm252_vm2, %v247_v31  ;;  %2021 = vmatprep.subr.msk.mxu0 %vm252_vm2, %v917_v29 }
  0xa0   : > { %2078 = vmatmul.mubr.msk.f32.vlgmr.msra.gmra.mrb[0].mxu1 %vm248_vm3, %v1997_v12  ;;  %2080 = vmatprep.subr.mxu1 %v2173_v0  ;;  %v1089_v48 = vsel %vm1088_vm7, %v1081_v33, %v1083_v28 }
  0xa1   : > { %v1085_v34 = vpop.permute.xlu0 %1084  ;;  %2081 = vmatpush3.msk.msra.mxu1 %vm252_vm2, %v226_v32  ;;  %2082 = vmatprep.mubr.msk.f32.mxu1 %vm2178_vm0, %v2173_v0 }
  0xa2   : > { %2085 = vmatprep.subr.mxu1 %v2173_v0  ;;  %v1090_v37 = vsel %vm1088_vm7, %v1083_v28, %v1085_v34  ;;  %1780 = vperm.xlu1 %2162, %v1777_v10  }
  0xa3   : > { %v741_v36 = vpop.permute.xlu1 %740 }
  0xa4   : > { %2083 = vmatmul.mubr.msk.f32.vlgmr.msra.gmra.mrb[2].mxu1 %vm248_vm3, %v227_v19  ;;  %v745_v42 = vsel %vm742_vm5, %v739_v17, %v741_v36 }
  0xa5   : > { %v568_v39 = vpop.permute.xlu0 %567  ;;  %2017 = vmatmul.mubr.msk.f32.vlgmr.msra.gmra.mrb[0].mxu0 %vm248_vm3, %v2014_v35  ;;  %2087 = vmatprep.mubr.msk.f32.mxu1 %vm2178_vm0, %v2173_v0 }
  0xa6   : > { %v572_v40 = vsel %vm569_vm4, %v566_v15, %v568_v39  ;;  %2022 = vmatpush1.msk.msra.mxu0 %vm252_vm2, %v916_v38  ;;  %992 = vmatprep.mubr.f32.mxu0 %v2173_v0  ;;  %v1776_v39 = vld [vmem:[%s2412_s3] sm:$0x7] }
  0xa7   : > { %v1258_v41 = vpop.permute.xlu1 %1257  ;;  %2086 = vmatpush3.msk.msra.mxu1 %vm252_vm2, %v572_v40  ;;  %2027 = vmatprep.subr.msk.mxu0 %vm252_vm2, %v1090_v37 }
  0xa8   : > { %2090 = vmatprep.subr.mxu1 %v2173_v0  ;;  %2088 = vmatmul.mubr.msk.f32.vlgmr.msra.gmra.mrb[4].mxu1 %vm248_vm3, %v2008_v26 }
  0xa9   : > { %v1256_v43 = vpop.permute.xlu0 %1255  ;;  %2091 = vmatpush3.msk.msra.mxu1 %vm252_vm2, %v745_v42  ;;  %2092 = vmatprep.mubr.msk.f32.mxu1 %vm2178_vm0, %v2173_v0 }
  0xaa   : > { %2095 = vmatprep.subr.mxu1 %v2173_v0  ;;  %v1263_v46 = vsel %vm1261_vm8, %v1256_v43, %v1258_v41 }
  0xab   : > { %v914_v45 = vpop.permute.xlu1 %913 }
  0xac   : > { %v918_v47 = vsel %vm915_vm6, %v912_v25, %v914_v45  ;;  %2093 = vmatmul.mubr.msk.f32.vlgmr.msra.gmra.mrb[6].mxu1 %vm248_vm3, %v2014_v35 }
  0xad   : > { %v1254_v49 = vpop.permute.xlu0 %1253  ;;  %2023 = vmatmul.mubr.msk.f32.vlgmr.msra.gmra.mrb[0].mxu0 %vm248_vm3, %v2020_v44  ;;  %2096 = vmatpush3.msk.msra.mxu1 %vm252_vm2, %v918_v47 }
  0xae   : > { %2028 = vmatpush1.msk.msra.mxu0 %vm252_vm2, %v1089_v48  ;;  %2097 = vmatprep.mubr.msk.f32.mxu1 %vm2178_vm0, %v2173_v0  ;;  %v1262_v54 = vsel %vm1261_vm8, %v1254_v49, %v1256_v43 }
  0xaf   : > { %2033 = vmatprep.subr.msk.mxu0 %vm252_vm2, %v1263_v46  ;;  %v1429_v50 = vpop.permute.xlu1 %1428  ;;  %2100 = vmatprep.subr.mxu1 %v2173_v0 }
  0xb0   : > { %2098 = vmatmul.mubr.msk.f32.vlgmr.msra.gmra.mrb[8].mxu1 %vm248_vm3, %v2020_v44  ;;  %1165 = vmatprep.mubr.f32.mxu0 %v2173_v0 }
  0xb1   : > { %v1087_v51 = vpop.permute.xlu0 %1086  ;;  %2102 = vmatprep.mubr.msk.f32.mxu1 %vm2178_vm0, %v2173_v0 }
  0xb2   : > { %v1091_v52 = vsel %vm1088_vm7, %v1085_v34, %v1087_v51 }
  0xb3   : > { %2101 = vmatpush3.msk.msra.mxu1 %vm252_vm2, %v1091_v52  ;;  %v1427_v55 = vpop.permute.xlu1 %1426 }
  0xb4   : > { %2103 = vmatmul.mubr.msk.f32.vlgmr.msra.gmra.mrb[10].mxu1 %vm248_vm3, %v2026_v53  ;;  %2105 = vmatprep.subr.mxu1 %v2173_v0  ;;  %v1435_v63 = vsel %vm1434_vm9, %v1427_v55, %v1429_v50 }
  0xb5   : > { %v1431_v56 = vpop.permute.xlu0 %1430  ;;  %2029 = vmatmul.mubr.msk.f32.vlgmr.msra.gmra.mrb[0].mxu0 %vm248_vm3, %v2026_v53  ;;  %2107 = vmatprep.mubr.msk.f32.mxu1 %vm2178_vm0, %v2173_v0 }
  0xb6   : > { %v1436_v57 = vsel %vm1434_vm9, %v1429_v50, %v1431_v56  ;;  %2034 = vmatpush1.msk.msra.mxu0 %vm252_vm2, %v1262_v54  ;;  %1338 = vmatprep.mubr.f32.mxu0 %v2173_v0 }
  0xb7   : > { %v1433_v58 = vpop.permute.xlu1 %1432  ;;  %2039 = vmatprep.subr.msk.mxu0 %vm252_vm2, %v1436_v57 }
  0xb8   : > { %v1437_v61 = vsel %vm1434_vm9, %v1431_v56, %v1433_v58 }
  0xb9   : > { %v1260_v59 = vpop.permute.xlu0 %1259 }
  0xba   : > { %v1264_v62 = vsel %vm1261_vm8, %v1258_v41, %v1260_v59 }
  0xbb   : > { %2106 = vmatpush3.msk.msra.mxu1 %vm252_vm2, %v1264_v62  ;;  %v1604_v1 = vpop.permute.xlu1 %1603 }
  0xbc   : > { %2108 = vmatmul.mubr.msk.f32.vlgmr.msra.gmra.mrb[12].mxu1 %vm248_vm3, %v2032_v60  ;;  %2110 = vmatprep.subr.mxu1 %v2173_v0 }
  0xbd   : > { %2035 = vmatmul.mubr.msk.f32.vlgmr.msra.gmra.mrb[0].mxu0 %vm248_vm3, %v2032_v60  ;;  %2111 = vmatpush3.msk.msra.mxu1 %vm252_vm2, %v1437_v61  ;;  %v1602_v2 = vpop.permute.xlu0 %1601 }
  0xbe   : > { %2040 = vmatpush1.msk.msra.mxu0 %vm252_vm2, %v1435_v63  ;;  %v1609_v4 = vsel %vm1607_vm10, %v1602_v2, %v1604_v1  ;;  %2112 = vmatprep.mubr.msk.f32.mxu1 %vm2178_vm0, %v2173_v0 }
  0xbf   : > { %v1606_v5 = vpop.permute.xlu1 %1605  ;;  %2115 = vmatprep.subr.mxu1 %v2173_v0  ;;  %1511 = vmatprep.mubr.f32.mxu0 %v2173_v0 }
  0xc0   : > { %2113 = vmatmul.mubr.msk.f32.vlgmr.msra.gmra.mrb[14].mxu1 %vm248_vm3, %v2038_v3  ;;  %v1610_v6 = vsel %vm1607_vm10, %v1604_v1, %v1606_v5  ;;  %2045 = vmatprep.subr.msk.mxu0 %vm252_vm2, %v1609_v4 }
  0xc1   : > { %v1600_v7 = vpop.permute.xlu0 %1599  ;;  %2116 = vmatpush3.msk.msra.mxu1 %vm252_vm2, %v1610_v6  ;;  %2117 = vmatprep.mubr.msk.f32.mxu1 %vm2178_vm0, %v2173_v0 }
  0xc2   : > { %2120 = vmatprep.subr.mxu1 %v2173_v0  ;;  %v1608_v9 = vsel %vm1607_vm10, %v1600_v7, %v1602_v2 }
  0xc4   : > { %2118 = vmatmul.mubr.msk.f32.vlgmr.msra.gmra.mrb[16].mxu1 %vm248_vm3, %v2044_v8 }
  0xc5   : > { %2041 = vmatmul.mubr.msk.f32.vlgmr.msra.gmra.mrb[0].mxu0 %vm248_vm3, %v2038_v3  ;;  %2122 = vmatprep.mubr.msk.f32.mxu1 %vm2178_vm0, %v2173_v0 }
  0xc6   : > { %2046 = vmatpush1.msk.msra.mxu0 %vm252_vm2, %v1608_v9  ;;  %1684 = vmatprep.mubr.f32.mxu0 %v2173_v0 }
  0xcd   : > { %2047 = vmatmul.mubr.msk.f32.vlgmr.msra.gmra.mrb[0].mxu0 %vm248_vm3, %v2044_v8 }
  0xce   : > { %1851 = vmatprep.mubr.f32.mxu0 %v2173_v0 }
  0xd2   : > { %v1768_v34 = vpop.permute.xlu0 %1767 }
 0x121   : > { %v1781_v46 = vpop.permute.xlu1 %1780 }
 0x173   : > { %v396_v11 = vpop.f32.mrb[0].mxu1 }
 0x174   : > { %v2079_v12 = vpop.f32.mrb[1].mxu1 }
 0x177   : > { %v549_v13 = vpop.f32.mrb[2].mxu1 }
 0x178   : > { %v550_v14 = vadd.f32 %v549_v13, %v396_v11  ;;  %v2084_v15 = vpop.f32.mrb[3].mxu1 }
 0x17b   : > { %v719_v16 = vpop.f32.mrb[4].mxu1 }
 0x17c   : > { %v725_v17 = vadd.f32 %v719_v16, %v550_v14  ;;  %v2089_v18 = vpop.f32.mrb[5].mxu1 }
 0x17f   : > { %v892_v19 = vpop.f32.mrb[6].mxu1 }
 0x180   : > { %v898_v20 = vadd.f32 %v892_v19, %v725_v17  ;;  %v2094_v21 = vpop.f32.mrb[7].mxu1 }
 0x183   : > { %v1065_v22 = vpop.f32.mrb[8].mxu1 }
 0x184   : > { %v1071_v23 = vadd.f32 %v1065_v22, %v898_v20  ;;  %v2099_v24 = vpop.f32.mrb[9].mxu1 }
 0x187   : > { %v1238_v0 = vpop.f32.mrb[10].mxu1 }
 0x188   : > { %v1244_v25 = vadd.f32 %v1238_v0, %v1071_v23  ;;  %v2104_v26 = vpop.f32.mrb[11].mxu1 }
 0x18f   : > { %v1411_v27 = vpop.f32.mrb[12].mxu1 }
 0x190   : > { %v1417_v28 = vadd.f32 %v1411_v27, %v1244_v25  ;;  %v2109_v29 = vpop.f32.mrb[13].mxu1 }
 0x193   : > { %v1584_v30 = vpop.f32.mrb[14].mxu1 }
 0x194   : > { %v1590_v31 = vadd.f32 %v1584_v30, %v1417_v28  ;;  %v2114_v32 = vpop.f32.mrb[15].mxu1 }
 0x197   : > { %v1757_v33 = vpop.f32.mrb[16].mxu1 }
 0x198   : > { %v1763_v35 = vadd.f32 %v1757_v33, %v1590_v31  ;;  %v2119_v36 = vpop.f32.mrb[17].mxu1 }
 0x19a   : > { %v1772_v37 = vadd.f32 %v1768_v34, %v1763_v35 }
 0x19c   : > { %v1775_v38 = vmax.f32 %v1772_v37, 0.0 }
 0x19e   : > { %2121 = vmatpush3.msra.mxu1 %v1775_v38 }
 0x19f   : > { %2123 = vmatmul.mubr.msk.f32.vlgmr.msra.gmra.mrb[18].mxu1 %vm1783_vm11, %v1776_v39 }
 0x1a0   : > { %v1686_v40 = vpop.f32.mrb[0].mxu0 }
 0x1a1   : > { %v1770_v41 = vadd.f32 %v1768_v34, %v1686_v40  ;;  %v1688_v42 = vpop.f32.mrb[1].mxu0 }
 0x1a2   : > { %v1771_v43 = vadd.f32 %v1768_v34, %v1688_v42 }
 0x1a3   : > { %v1773_v45 = vmax.f32 %v1770_v41, 0.0 }
 0x1a4   : > { %v1774_v44 = vmax.f32 %v1771_v43, 0.0 }
 0x1a6   : > { %1787 = vmatprep.subr.mxu0 %v1774_v44 }
 0x1a7   : > { %1788 = vmatpush1.msra.mxu0 %v1773_v45 }
 0x1a8   : > { %2050 = vmatmul.mubr.msk.f32.vlgmr.msra.gmra.mrb[2].mxu0 %vm1783_vm11, %v1776_v39 }
 0x272   : > { %v1924_v47 = vpop.f32.mrb[18].mxu1 }
 0x273   : > { %v1925_v48 = vadd.f32 %v1924_v47, %v1781_v46  ;;  %v2124_v49 = vpop.f32.mrb[19].mxu1 }
 0x275   : > { %1933 = vst [vmem:[%s224_s11 + $0x8] sm:$0x7] %v1925_v48 }
 0x27b   : > { %v1853_v50 = vpop.f32.mrb[2].mxu0 }
 0x27c   : > { %v1854_v51 = vadd.f32 %v1853_v50, %v1781_v46  ;;  %v1855_v52 = vpop.f32.mrb[3].mxu0 }
 0x27d   : > { %v1856_v53 = vadd.f32 %v1855_v52, %v1781_v46 }
 0x27f   : > { %v1930_v54 = vcombine.low %v1854_v51, %v1856_v53 }
 0x281   : > { %1932 = vst [vmem:[%s224_s11] sm:$0x77] %v1930_v54 }
 0x282 PF: > { %s15_s18 = sadd.s32 1, %s2171_s18  }
 0x283   : > { %p12_p4 = scmp.ge.s32.totalorder %s15_s18, 4  }
 0x285   :  { %14 = sbr.rel (!%p12_p4) target bundleno = 1 (0x1), region = 78 }

</bundles_post_ra>
